<compile_context>
chip_gen: v5e
topology: v5e:2x2
jax: 0.10.0
libtpu: 0.0.40
codegen_flags: <defaults>
</compile_context>

<pallas_src>
import functools

import jax
import jax.numpy as jnp
from jax.experimental import pallas as pl
from jax.experimental.pallas import tpu as pltpu


def gat_kernel(dst_ref, src_ref, hfeat_ref, out_ref, l_sc, acc_sc,
               *, neg_slope, src_tile, resident):
    j = pl.program_id(1)

    @pl.when(j == 0)
    def _init():
        l_sc[...] = jnp.zeros_like(l_sc)
        acc_sc[...] = jnp.zeros_like(acc_sc)

    s_dst = dst_ref[:, 0:1]                                   # [td, 1] dst score
    row_max = dst_ref[:, 1:2]                                  # [td, 1] exact softmax row max
    s_src = src_ref[...]                                       # [1, ts] src scores

    # e[dst, src] = LeakyReLU(s_dst[dst] + s_src[src])  (VPU broadcast-add, no matmul).
    e = s_dst + s_src                                          # [td, ts]
    e = jnp.where(e >= 0, e, neg_slope * e)

    # Exact max was precomputed (LeakyReLU is monotone), so no online rescale:
    # just accumulate exp-sums and exp @ h_feat.
    p = jnp.exp(e - row_max)                                   # [td, ts], f32, <= 1

    if resident:
        # h_feat lives fully in VMEM (constant block index); slice this src tile.
        start = pl.multiple_of(j * src_tile, src_tile)
        feats = hfeat_ref[pl.ds(start, src_tile), :]           # [ts, feat], bf16
    else:
        feats = hfeat_ref[...]                                 # [ts, feat], bf16

    l_sc[...] += jnp.sum(p, axis=-1, keepdims=True)
    acc_sc[...] += jnp.dot(p.astype(feats.dtype), feats,
                           preferred_element_type=jnp.float32)  # bf16 x bf16 -> f32 acc

    @pl.when(j == pl.num_programs(1) - 1)
    def _finalize():
        inv_l = pl.reciprocal(l_sc[...], approx=True)          # EUP slot, not VPU divide
        out_ref[...] = (acc_sc[...] * inv_l).astype(out_ref.dtype)


def gat_layer_forward(h, w_atten, neg_slope=0.98, dst_block=256, src_block=256,
                      resident_limit_bytes=16 * 1024 * 1024):
    """h: [N, T, D] f32 node features; w_atten: [1, 2D] = nn.Linear(2D, 1, bias=False).weight."""
    N, T, D = h.shape
    feat = T * D

    h0 = h[:, 0, :].astype(jnp.float32)                        # [N, D]
    h_feat = h.reshape(N, feat).astype(jnp.bfloat16)           # [N, T*D], bf16 stream

    # Hoisted score matmuls: one tiny [N, D] x [D] pair in the wrapper.
    w_src = w_atten[0, :D].astype(jnp.float32)
    w_dst = w_atten[0, D:].astype(jnp.float32)
    s_src_all = h0 @ w_src                                     # [N]
    s_dst_all = h0 @ w_dst                                     # [N]

    # Exact per-dst softmax max via LeakyReLU monotonicity (slope > 0):
    #   max_src LReLU(s_dst + s_src) = LReLU(s_dst + max_src s_src)
    s_src_max = jnp.max(s_src_all)
    row_max = s_dst_all + s_src_max
    row_max = jnp.where(row_max >= 0, row_max, neg_slope * row_max)

    dst_scores = jnp.stack([s_dst_all, row_max], axis=1)       # [N, 2]
    src_scores = s_src_all.reshape(1, N)                       # [1, N]

    td = min(dst_block, N)
    ts = min(src_block, N)
    # TODO(synk): mask ragged tail blocks; current tiling requires N % block == 0.
    assert N % td == 0 and N % ts == 0, "N must be divisible by the chosen block sizes"
    grid = (N // td, N // ts)

    # Pin h_feat fully resident in VMEM when it is small enough (streamed from HBM
    # exactly once); otherwise tile it (ts, feat) per src step.
    resident = (N * feat * 2) <= resident_limit_bytes
    if resident:
        hfeat_spec = pl.BlockSpec((N, feat), lambda i, j: (0, 0))
        hfeat_vmem = 2 * N * feat * 2                          # conservative (2-buf) estimate
    else:
        hfeat_spec = pl.BlockSpec((ts, feat), lambda i, j: (j, 0))
        hfeat_vmem = 2 * ts * feat * 2

    # Explicit VMEM budget: hfeat + double-buffered out + f32 accumulator + scores + slack.
    vmem_needed = (hfeat_vmem
                   + 2 * td * feat * 4                         # out block, double-buffered
                   + td * feat * 4                             # acc scratch
                   + 2 * (2 * td + ts) * 4                     # score blocks (tiny)
                   + (2 << 20))                                # headroom
    vmem_limit = int(min(max(int(vmem_needed * 1.25), 32 * 1024 * 1024),
                         64 * 1024 * 1024))                    # <= v7x physical VMEM

    kernel = functools.partial(gat_kernel, neg_slope=float(neg_slope),
                               src_tile=ts, resident=resident)
    out_flat = pl.pallas_call(
        kernel,
        out_shape=jax.ShapeDtypeStruct((N, feat), jnp.float32),
        grid_spec=pltpu.PrefetchScalarGridSpec(
            num_scalar_prefetch=0,
            grid=grid,
            in_specs=[
                pl.BlockSpec((td, 2), lambda i, j: (i, 0)),        # [s_dst, row_max] per dst block
                pl.BlockSpec((1, ts), lambda i, j: (0, j)),        # s_src per src block
                hfeat_spec,                                        # src features (bf16)
            ],
            out_specs=pl.BlockSpec((td, feat), lambda i, j: (i, 0)),   # lane-dense (feat % 128 == 0)
            scratch_shapes=[
                pltpu.VMEM((td, 1), jnp.float32),                  # running denominator
                pltpu.VMEM((td, feat), jnp.float32),               # running accumulator
            ],
        ),
        compiler_params=pltpu.CompilerParams(
            dimension_semantics=("parallel", "arbitrary"),          # megacore-shard dst blocks
            vmem_limit_bytes=vmem_limit),
    )(dst_scores, src_scores, h_feat)
    return out_flat.reshape(N, T, D)


if __name__ == "__main__":
    # Small shapes: N=8 nodes, T=8 tokens per node, hidden_size D=32.
    N, T, D = 8, 8, 32
    key = jax.random.PRNGKey(0)
    k_h, k_w = jax.random.split(key)

    h = jax.random.normal(k_h, (N, T, D), dtype=jnp.float32)

    # Deterministic init of atten1 = nn.Linear(2D, 1, bias=False): U(-1/sqrt(2D), 1/sqrt(2D)).
    bound = float(1.0 / (2.0 * D) ** 0.5)
    w_atten = jax.random.uniform(k_w, (1, 2 * D), minval=-bound, maxval=bound,
                                 dtype=jnp.float32)

    out = gat_layer_forward(h, w_atten)
    out = jax.block_until_ready(out)

    # Pure-JAX f32 reference (same complete-graph semantics).
    neg_slope = 0.98
    s_src = h[:, 0, :] @ w_atten[0, :D]
    s_dst = h[:, 0, :] @ w_atten[0, D:]
    e = s_dst[:, None] + s_src[None, :]
    e = jnp.where(e >= 0, e, neg_slope * e)
    alpha = jax.nn.softmax(e, axis=-1)
    ref = jnp.einsum("ji,itd->jtd", alpha, h)

    assert out.shape == (N, T, D)
    # Tolerance accounts for bf16 aggregation operands + approx reciprocal.
    assert jnp.allclose(out, ref, atol=2e-2, rtol=2e-2), "mismatch vs reference"

    # TODO(synk): nn.Dropout(graph_drop=0) and BCEWithLogitsLoss are no-ops in this forward
    # (dropout p=0, loss never invoked), so they are intentionally omitted from the kernel.
    print("KERNEL_OK")
</pallas_src>

<mosaic_0001>
module attributes {stable_mosaic.version = 11 : i64} {
  func.func @gat_kernel(%arg0: i32, %arg1: i32, %arg2: memref<8x2xf32, #tpu.memory_space<vmem>>, %arg3: memref<1x8xf32, #tpu.memory_space<vmem>>, %arg4: memref<8x256xbf16, #tpu.memory_space<vmem>>, %arg5: memref<8x256xf32, #tpu.memory_space<vmem>>, %arg6: memref<8x1xf32, #tpu.memory_space<vmem>>, %arg7: memref<8x256xf32, #tpu.memory_space<vmem>>) attributes {dimension_semantics = [#tpu.dimension_semantics<parallel>, #tpu.dimension_semantics<arbitrary>], iteration_bounds = array<i64: 1, 1>, scalar_prefetch = 0 : i64, scratch_operands = 2 : i64, tpu.core_type = #tpu.core_type<tc>, window_params = [{transform_indices = @transform_0, window_bounds = array<i64: 8, 2>}, {transform_indices = @transform_1, window_bounds = array<i64: 1, 8>}, {pipeline_mode = #tpu.pipeline_mode<synchronous>, transform_indices = @transform_2, window_bounds = array<i64: 8, 256>}, {transform_indices = @transform_3, window_bounds = array<i64: 8, 256>}]} {
    %c0_i32 = arith.constant 0 : i32
    %0 = arith.cmpi eq, %arg1, %c0_i32 : i32
    %1 = arith.extui %0 : i1 to i32
    %c0_i32_0 = arith.constant 0 : i32
    %2 = arith.cmpi ne, %1, %c0_i32_0 : i32
    scf.if %2 {
      %cst_19 = arith.constant 0.000000e+00 : f32
      %34 = vector.broadcast %cst_19 : f32 to vector<8x1xf32>
      %c0_20 = arith.constant 0 : index
      %c0_21 = arith.constant 0 : index
      %35 = vector.load %arg6[%c0_20, %c0_21] : memref<8x1xf32, #tpu.memory_space<vmem>>, vector<8x1xf32>
      tpu.vector_store %arg6[%c0_20, %c0_21], %34 {strides = array<i32>} : memref<8x1xf32, #tpu.memory_space<vmem>>, vector<8x1xf32>,
      %cst_22 = arith.constant 0.000000e+00 : f32
      %36 = vector.broadcast %cst_22 : f32 to vector<8x256xf32>
      %c0_23 = arith.constant 0 : index
      %c0_24 = arith.constant 0 : index
      %37 = vector.load %arg7[%c0_23, %c0_24] : memref<8x256xf32, #tpu.memory_space<vmem>>, vector<8x256xf32>
      tpu.vector_store %arg7[%c0_23, %c0_24], %36 {strides = array<i32>} : memref<8x256xf32, #tpu.memory_space<vmem>>, vector<8x256xf32>,
    } else {
    }
    %c0 = arith.constant 0 : index
    %c0_1 = arith.constant 0 : index
    %3 = vector.load %arg2[%c0, %c0_1] : memref<8x2xf32, #tpu.memory_space<vmem>>, vector<8x1xf32>
    %c0_2 = arith.constant 0 : index
    %c1 = arith.constant 1 : index
    %4 = vector.load %arg2[%c0_2, %c1] : memref<8x2xf32, #tpu.memory_space<vmem>>, vector<8x1xf32>
    %c0_3 = arith.constant 0 : index
    %c0_4 = arith.constant 0 : index
    %5 = vector.load %arg3[%c0_3, %c0_4] : memref<1x8xf32, #tpu.memory_space<vmem>>, vector<1x8xf32>
    %6 = vector.broadcast %3 : vector<8x1xf32> to vector<8x8xf32>
    %7 = vector.broadcast %5 : vector<1x8xf32> to vector<8x8xf32>
    %8 = arith.addf %6, %7 : vector<8x8xf32>
    %cst = arith.constant 0.000000e+00 : f32
    %9 = vector.broadcast %cst : f32 to vector<8x8xf32>
    %10 = arith.cmpf oge, %8, %9 : vector<8x8xf32>
    %cst_5 = arith.constant 9.800000e-01 : f32
    %11 = vector.broadcast %cst_5 : f32 to vector<8x8xf32>
    %12 = arith.mulf %11, %8 : vector<8x8xf32>
    %13 = arith.select %10, %8, %12 : vector<8x8xi1>, vector<8x8xf32>
    %14 = vector.broadcast %4 : vector<8x1xf32> to vector<8x8xf32>
    %15 = arith.subf %13, %14 : vector<8x8xf32>
    %16 = math.exp %15 : vector<8x8xf32>
    %c8_i32 = arith.constant 8 : i32
    %17 = arith.muli %arg1, %c8_i32 : i32
    %18 = tpu.assume_multiple %17, 8 : i32
    %19 = arith.index_cast %18 : i32 to index
    %c0_6 = arith.constant 0 : index
    %20 = vector.load %arg4[%19, %c0_6] : memref<8x256xbf16, #tpu.memory_space<vmem>>, vector<8x256xbf16>
    %c0_7 = arith.constant 0 : index
    %c0_8 = arith.constant 0 : index
    %21 = vector.load %arg6[%c0_7, %c0_8] : memref<8x1xf32, #tpu.memory_space<vmem>>, vector<8x1xf32>
    %cst_9 = arith.constant dense<0.000000e+00> : vector<8xf32>
    %22 = vector.multi_reduction <add>, %16, %cst_9 [1] : vector<8x8xf32> to vector<8xf32>
    %23 = vector.shape_cast %22 : vector<8xf32> to vector<8x1xf32>
    %24 = arith.addf %21, %23 : vector<8x1xf32>
    %c0_10 = arith.constant 0 : index
    %c0_11 = arith.constant 0 : index
    %25 = vector.load %arg6[%c0_10, %c0_11] : memref<8x1xf32, #tpu.memory_space<vmem>>, vector<8x1xf32>
    tpu.vector_store %arg6[%c0_10, %c0_11], %24 {strides = array<i32>} : memref<8x1xf32, #tpu.memory_space<vmem>>, vector<8x1xf32>,
    %c0_12 = arith.constant 0 : index
    %c0_13 = arith.constant 0 : index
    %26 = vector.load %arg7[%c0_12, %c0_13] : memref<8x256xf32, #tpu.memory_space<vmem>>, vector<8x256xf32>
    %27 = arith.truncf %16 : vector<8x8xf32> to vector<8x8xbf16>
    %cst_14 = arith.constant dense<0.000000e+00> : vector<8x256xf32>
    %28 = tpu.matmul %27, %20, %cst_14 {dimension_numbers = #tpu.dot_dimension_numbers<[1], [0], [0], [1], [0, 0, 1, 1], [], []>} : vector<8x8xbf16>, vector<8x256xbf16>, vector<8x256xf32> -> vector<8x256xf32>
    %29 = arith.addf %26, %28 : vector<8x256xf32>
    %c0_15 = arith.constant 0 : index
    %c0_16 = arith.constant 0 : index
    %30 = vector.load %arg7[%c0_15, %c0_16] : memref<8x256xf32, #tpu.memory_space<vmem>>, vector<8x256xf32>
    tpu.vector_store %arg7[%c0_15, %c0_16], %29 {strides = array<i32>} : memref<8x256xf32, #tpu.memory_space<vmem>>, vector<8x256xf32>,
    %c0_i32_17 = arith.constant 0 : i32
    %31 = arith.cmpi eq, %arg1, %c0_i32_17 : i32
    %32 = arith.extui %31 : i1 to i32
    %c0_i32_18 = arith.constant 0 : i32
    %33 = arith.cmpi ne, %32, %c0_i32_18 : i32
    scf.if %33 {
      %c0_19 = arith.constant 0 : index
      %c0_20 = arith.constant 0 : index
      %34 = vector.load %arg6[%c0_19, %c0_20] : memref<8x1xf32, #tpu.memory_space<vmem>>, vector<8x1xf32>
      %35 = tpu.reciprocal %34 {approx = true} : vector<8x1xf32> -> vector<8x1xf32>
      %c0_21 = arith.constant 0 : index
      %c0_22 = arith.constant 0 : index
      %36 = vector.load %arg7[%c0_21, %c0_22] : memref<8x256xf32, #tpu.memory_space<vmem>>, vector<8x256xf32>
      %37 = vector.broadcast %35 : vector<8x1xf32> to vector<8x256xf32>
      %38 = arith.mulf %36, %37 : vector<8x256xf32>
      %c0_23 = arith.constant 0 : index
      %c0_24 = arith.constant 0 : index
      %39 = vector.load %arg5[%c0_23, %c0_24] : memref<8x256xf32, #tpu.memory_space<vmem>>, vector<8x256xf32>
      tpu.vector_store %arg5[%c0_23, %c0_24], %38 {strides = array<i32>} : memref<8x256xf32, #tpu.memory_space<vmem>>, vector<8x256xf32>,
    } else {
    }
    return
  }
  func.func @transform_0(%arg0: i32, %arg1: i32) -> (i32, i32) {
    %c0_i32 = arith.constant 0 : i32
    %c0_i32_0 = arith.constant 0 : i32
    return %arg0, %c0_i32 : i32, i32
  }
  func.func @transform_1(%arg0: i32, %arg1: i32) -> (i32, i32) {
    %c0_i32 = arith.constant 0 : i32
    %c0_i32_0 = arith.constant 0 : i32
    return %c0_i32, %arg1 : i32, i32
  }
  func.func @transform_2(%arg0: i32, %arg1: i32) -> (i32, i32) {
    %c0_i32 = arith.constant 0 : i32
    %c0_i32_0 = arith.constant 0 : i32
    %c0_i32_1 = arith.constant 0 : i32
    return %c0_i32, %c0_i32_0 : i32, i32
  }
  func.func @transform_3(%arg0: i32, %arg1: i32) -> (i32, i32) {
    %c0_i32 = arith.constant 0 : i32
    %c0_i32_0 = arith.constant 0 : i32
    return %arg0, %c0_i32 : i32, i32
  }
}

</mosaic_0001>

<bundles_post_ra>
// kernel: tpu_custom_call.1
= control target key start
LH: loop header
LB: loop body
LE: loop exit
PB: predicated region body
PF: predicated region fallthrough
CT: control target
= control target key end

     0   :  { %v183_v1 = vmov 0   ;;  %s219_s0 = inlined_call_operand.vmem [shape: f32[8,2], index: 0, kind: input, shape index: {}]   ;;  %s220_s1 = inlined_call_operand.vmem [shape: f32[1,8], index: 1, kind: input, shape index: {}]   ;;  %s221_s2 = inlined_call_operand.vmem [shape: bf16[8,256], index: 2, kind: input, shape index: {}]   ;;  %s222_s3 = inlined_call_operand.hbm [shape: f32[8,256], index: 3, kind: output, shape index: {}]  }
   0x1   :  { %v24_v0 = vld [vmem:[%s219_s0] sm:$0xff]  ;;  %148 = vset.pattern.permute.xlu0 %v183_v1  ;;  %150 = vset.pattern.permute.xlu1 %v183_v1 }
   0x2   :  { %8 = vsyncpa [#allocation5], 0  ;;  %28 = vperm.xlu0 %148, %v24_v0   ;;  %v184_v2 = vmov 1   ;;  %v51_v3 = vld [vmem:[%s221_s2] sm:$0xff]  ;;  %vm71_vm0 = vcmask 1043456   ;;  %vm53_vm2 = vcmask 64512  }
   0x3   :  { %v64_v4 = vunpack.c.l.b16 %v51_v3  ;;  %v65_v5 = vunpack.c.h.b16 %v51_v3  ;;  %v152_v10 = vld [vmem:[%s220_s1] ss:$0 sm:$0xff]  ;;  %vm20_vm3 = vcmask 7168   ;;  %v185_v21 = vmov 0.0   ;;  %s186_s1 = smov [#allocation4]   ;;  %s131_s19 = sshll.u32 %s222_s3, 4  ;;  %s132_s19 = int_to_ptr.hbm [resolvable:$true] %s131_s19 }
   0x4   :  { %21 = vst.msk [vmem:[#allocation2] sm:$0xff] %vm20_vm3, %v185_v21  ;;  %s129_s2 = sshll.u32 %s186_s1, 4  ;;  %s130_s2 = int_to_ptr.vmem [resolvable:$true] %s129_s2 }
   0x5   :  { %v66_v6 = vpack.c.b16 %v64_v4, %v64_v4  ;;  %v67_v7 = vpack.c.b16 %v65_v5, %v65_v5 }
   0x7   :  { %v73_v8 = vsel %vm71_vm0, %v66_v6, 0  ;;  %v76_v9 = vsel %vm71_vm0, %v67_v7, 0 }
   0x8   :  { %85 = vmatpush.bf16.msra.mxu0 %v73_v8  ;;  %98 = vmatpush.bf16.msra.mxu1 %v76_v9 }
   0xa   :  { %149 = vset.pattern.permute.xlu0 %v184_v2 }
   0xb   :  { %39 = vperm.xlu0 %149, %v24_v0   ;;  %v52_v22 = vld [vmem:[#allocation2] sm:$0xff] }
  0x13   :  { %151 = vset.pattern.permute.xlu0 %v183_v1 }
  0x74   :  { %v29_v11 = vpop.permute.xlu0 %28 }
  0x75   :  { %v34_v12 = vadd.f32 %v152_v10, %v29_v11 }
  0x77   :  { %v36_v13 = vmul.f32 0.98, %v34_v12  ;;  %vm35_vm1 = vcmp.ge.f32.partialorder %v34_v12, 0.0 }
  0x79   :  { %v37_v14 = vsel %vm35_vm1, %v34_v12, %v36_v13 }
  0x7d   :  { %v40_v15 = vpop.permute.xlu0 %39 }
  0x7e   :  { %v42_v16 = vsub.f32 %v37_v14, %v40_v15 }
  0x80   :  { %v43_v17 = vmul.f32 1.442695, %v42_v16 }
  0x82   :  { %153 = vpow2.f32 %v43_v17 }
  0x88   :  { %v154_v18 = vpop.eup %153 }
  0x89   :  { %v54_v19 = vsel %vm53_vm2, %v154_v18, 0.0  ;;  %v62_v20 = vpack.c.bf16 %v154_v18, %v154_v18 }
  0x8a   :  { %55 = vadd.xlane.f32.xlu1 %v54_v19 }
  0x8b   :  { %142 = vmatmul.msk.bf16.vlgmr.msra.gmra.mxu0 %vm53_vm2, %v62_v20  ;;  %143 = vmatmul.msk.bf16.vlgmr.msra.gmra.mxu1 %vm53_vm2, %v62_v20 }
  0xfd   :  { %v56_v23 = vpop.xlane.xlu1 %55 }
  0xfe   :  { %v57_v24 = vadd.f32 %v56_v23, %v52_v22 }
 0x100   :  { %59 = vst.msk [vmem:[#allocation2] sm:$0xff] %vm20_vm3, %v57_v24 }
 0x107   :  { %v111_v25 = vld [vmem:[#allocation2] sm:$0xff] }
 0x108   :  { %v87_v26 = vpop.f32.mrf.mxu0  ;;  %v100_v27 = vpop.f32.mrf.mxu1  ;;  %155 = vrcp.f32 %v111_v25 }
 0x10e   :  { %v156_v28 = vpop.eup %155 }
 0x10f   :  { %117 = vperm.xlu1 %150, %v156_v28  }
 0x110   :  { %v89_v29 = vpop.f32.mrf.mxu0  ;;  %v102_v30 = vpop.f32.mrf.mxu1 }
 0x181   :  { %v118_v31 = vpop.permute.xlu1 %117 }
 0x182   :  { %v120_v32 = vmul.f32 %v118_v31, %v87_v26  ;;  %v121_v33 = vmul.f32 %v118_v31, %v100_v27 }
 0x184   :  { %122 = vst [vmem:[#allocation4] sm:$0xff] %v120_v32 }
 0x185   :  { %123 = vst [vmem:[#allocation4 + $0x8] sm:$0xff] %v121_v33 }
 0x186   :  { %134 = dma.vmem_to_hbm [thread:$0]  %s130_s2, 256, %s132_s19, [#allocation5]  }
 0x187   :  { %181 = dma.done.wait [#allocation5], 256  }
 0x188   :  { %182 = vsyncadd [#allocation5], 4294967040 }
 0x189   :  { %139 = vsyncpa [#allocation5], 1 }

</bundles_post_ra>
